<compile_context>
chip_gen: v7x
topology: tpu7x:2x2x1
jax: 0.10.0
libtpu: 0.0.40
codegen_flags: <defaults>
</compile_context>

<pallas_src>
import functools

import jax
import jax.numpy as jnp
from jax import lax
from jax.experimental import pallas as pl
from jax.experimental.pallas import tpu as pltpu

_N_POS = 3                       # translation components; the rest are quaternion
_MAX_TILE_B = 1 << 16            # default batch tile (multiple of 128)
_VMEM_LIMIT_BYTES = 32 * 1024 * 1024
_PALLAS_MIN_BATCH = 1024         # below this a fused XLA reduction is faster


def _make_pose_loss_kernel(*, B, D, TB, nsteps, rem):
    """Build the kernel body, closing over static sizes."""
    inv_3b = 1.0 / (3.0 * B)     # mean over B * 3 position elements
    inv_b = 1.0 / B              # mean over B orientation terms
    need_mask = (nsteps > 1) and (rem != 0)   # ragged last tile?

    def kernel(x_ref, t_ref, o_ref):
        # Full-block loads; upcast is a no-op for f32 and keeps the HBM read
        # in bf16 when the caller supplies bf16 poses.
        x = x_ref[...].astype(jnp.float32)                       # (D, TB)
        t = t_ref[...].astype(jnp.float32)                       # (D, TB)

        # Full-block VPU passes (no sublane-sliced loops).
        diff = jnp.abs(t - x)                                    # (D, TB)
        prod = x * t                                             # (D, TB)

        # Cross-sublane reduces (XLU slot).
        pos = jnp.sum(diff[:_N_POS, :], axis=0, keepdims=True)   # (1, TB)
        dot = jnp.sum(prod[_N_POS:, :], axis=0, keepdims=True)   # (1, TB)

        # Per-lane (per-sample) contribution to the total loss.
        partial = inv_3b * pos + inv_b * (1.0 - dot * dot)       # (1, TB)

        def store_tile_sum(vals):
            # Scalar tile partial, broadcast across a full 128-lane row so the
            # output store is lane-dense; the wrapper reads lane 0 of each row.
            o_ref[...] = jnp.full((1, 1, 128), jnp.sum(vals), dtype=jnp.float32)

        if need_mask:
            i = pl.program_id(0)
            last = nsteps - 1

            @pl.when(i != last)
            def _():
                store_tile_sum(partial)

            @pl.when(i == last)
            def _():
                # Only the ragged last tile pays for the mask.  jnp.where (not
                # a multiply) so garbage/NaN in the OOB-padded lanes cannot
                # poison the sum.
                lane = lax.broadcasted_iota(jnp.int32, partial.shape, 1)
                store_tile_sum(jnp.where(lane < rem, partial, 0.0))
        else:
            store_tile_sum(partial)

    return kernel


def _pose_loss_pallas(pred_t, target_t, tile_b):
    """pred_t, target_t: (D, B) lane-major pose tensors (f32 or bf16)."""
    D, B = pred_t.shape

    if B <= tile_b:
        # Single block covering the whole batch (block dims == array dims, so
        # no (8, 128) divisibility constraint applies).
        tb, nsteps, rem = B, 1, 0
    else:
        tb = tile_b                      # multiple of 128
        nsteps = pl.cdiv(B, tb)
        rem = B % tb

    kernel = _make_pose_loss_kernel(B=B, D=D, TB=tb, nsteps=nsteps, rem=rem)

    bytes_in = 2 * D * B * pred_t.dtype.itemsize
    cost = pl.CostEstimate(
        flops=20 * B,
        transcendentals=0,
        bytes_accessed=bytes_in + nsteps * 128 * 4,
    )

    partials = pl.pallas_call(
        kernel,
        out_shape=jax.ShapeDtypeStruct((nsteps, 1, 128), jnp.float32),
        grid=(nsteps,),
        in_specs=[
            pl.BlockSpec((D, tb), lambda i: (0, i)),
            pl.BlockSpec((D, tb), lambda i: (0, i)),
        ],
        out_specs=pl.BlockSpec((1, 1, 128), lambda i: (i, 0, 0)),
        compiler_params=pltpu.CompilerParams(
            dimension_semantics=("parallel",),          # no cross-step carry
            vmem_limit_bytes=_VMEM_LIMIT_BYTES,
            allow_input_fusion=[True, True],            # let XLA fuse the .T
        ),
        cost_estimate=cost,
    )(pred_t, target_t)

    # One lane per row holds the tile's partial sum; tiny final reduction.
    return jnp.sum(partials[:, 0, 0])


def _normalize_dtype(a):
    if a.dtype not in (jnp.bfloat16, jnp.float32):
        a = a.astype(jnp.float32)
    return a


def _to_lane_major(a):
    # (B, D) -> (D, B): batch on the 128-wide lane axis.
    return _normalize_dtype(a).T


@functools.partial(jax.jit, static_argnames=("tile_b",))
def _pose_loss_pallas_from_bd(pred, target, *, tile_b):
    # Transpose inside the jit so XLA can (with allow_input_fusion) fuse the
    # (B, 7) -> (7, B) relayout into the pallas_call operands instead of
    # materializing an extra HBM copy.
    return _pose_loss_pallas(_to_lane_major(pred), _to_lane_major(target), tile_b)


@functools.partial(jax.jit, static_argnames=("tile_b",))
def pose_cnn_loss_transposed(pred_t, target_t, object_index=None, *,
                             tile_b=_MAX_TILE_B):
    """Same loss, but takes already lane-major (7, B) pose tensors (no .T)."""
    del object_index  # unused by the reference forward
    return _pose_loss_pallas(_normalize_dtype(pred_t), _normalize_dtype(target_t),
                             tile_b)


def _reference_loss(pred, target):
    position_loss = jnp.abs(target[:, :_N_POS] - pred[:, :_N_POS]).mean()
    dot = (pred[:, _N_POS:] * target[:, _N_POS:]).sum(axis=1)
    orientation_loss = (1.0 - dot * dot).mean()
    return position_loss + orientation_loss


@jax.jit
def _reference_loss_f32(pred, target):
    return _reference_loss(pred.astype(jnp.float32), target.astype(jnp.float32))


def pose_cnn_loss(pred, target, object_index=None, *, use_pallas=None,
                  tile_b=_MAX_TILE_B):
    """Pallas implementation of PoseCNNLoss.forward.

    pred, target: (B, 7) arrays (3 translation + 4 quaternion components).
    object_index is ignored, exactly as in the PyTorch reference module.
    """
    del object_index  # unused by the reference forward
    B = pred.shape[0]
    if use_pallas is None:
        use_pallas = B >= _PALLAS_MIN_BATCH
    if not use_pallas:
        # Tiny batches: fixed launch/DMA overhead dominates the kernel; use a
        # fused XLA reduction instead.
        return _reference_loss_f32(pred, target)
    return _pose_loss_pallas_from_bd(pred, target, tile_b=int(tile_b))


def _make_inputs(key, B, D=7):
    k1, k2 = jax.random.split(key)
    pred = jax.random.normal(k1, (B, D), dtype=jnp.float32)
    target = jax.random.normal(k2, (B, D), dtype=jnp.float32)
    # Normalize target quaternions (typical pose data; math unchanged).
    quat = target[:, _N_POS:]
    quat = quat / jnp.linalg.norm(quat, axis=1, keepdims=True)
    target = jnp.concatenate([target[:, :_N_POS], quat], axis=1)
    return pred, target


if __name__ == "__main__":
    key = jax.random.PRNGKey(0)

    # Primary small case (matches the module's expected (B, 7) pose input).
    B = 8
    pred, target = _make_inputs(key, B)
    object_index = jnp.arange(B, dtype=jnp.int32)  # unused by the loss

    loss = jax.block_until_ready(
        pose_cnn_loss(pred, target, object_index, use_pallas=True))
    ref = _reference_loss(pred, target)
    assert jnp.allclose(loss, ref, atol=1e-5, rtol=1e-5), (loss, ref)

    # Awkward single-block batch size (lane dim not a multiple of 8/128).
    pred2, target2 = _make_inputs(jax.random.PRNGKey(1), 13)
    loss2 = jax.block_until_ready(pose_cnn_loss(pred2, target2, None, use_pallas=True))
    ref2 = _reference_loss(pred2, target2)
    assert jnp.allclose(loss2, ref2, atol=1e-5, rtol=1e-5), (loss2, ref2)

    # Multi-tile "parallel" grid with a ragged last tile, kept small by
    # forcing a 128-sample tile (exercises per-tile outputs + last-tile mask).
    pred3, target3 = _make_inputs(jax.random.PRNGKey(2), 397)
    loss3 = jax.block_until_ready(
        pose_cnn_loss(pred3, target3, None, use_pallas=True, tile_b=128))
    ref3 = _reference_loss(pred3, target3)
    assert jnp.allclose(loss3, ref3, atol=1e-5, rtol=1e-5), (loss3, ref3)

    # bf16 inputs (halved HBM read traffic); kernel upcasts to f32 internally.
    pred4 = pred3.astype(jnp.bfloat16)
    target4 = target3.astype(jnp.bfloat16)
    loss4 = jax.block_until_ready(
        pose_cnn_loss(pred4, target4, None, use_pallas=True, tile_b=128))
    ref4 = _reference_loss(pred4.astype(jnp.float32), target4.astype(jnp.float32))
    assert jnp.allclose(loss4, ref4, atol=1e-4, rtol=1e-4), (loss4, ref4)

    # Default dispatch at tiny batch takes the fused-XLA fallback path.
    loss5 = jax.block_until_ready(pose_cnn_loss(pred, target, object_index))
    assert jnp.allclose(loss5, ref, atol=1e-5, rtol=1e-5), (loss5, ref)

    print("KERNEL_OK")
</pallas_src>

<mosaic_0001>
module attributes {stable_mosaic.version = 11 : i64} {
  func.func @kernel(%arg0: i32, %arg1: memref<7x8xf32, #tpu.memory_space<vmem>>, %arg2: memref<7x8xf32, #tpu.memory_space<vmem>>, %arg3: memref<1x1x128xf32, #tpu.memory_space<vmem>>) attributes {dimension_semantics = [#tpu.dimension_semantics<parallel>], iteration_bounds = array<i64: 1>, scalar_prefetch = 0 : i64, scratch_operands = 0 : i64, tpu.core_type = #tpu.core_type<tc>, window_params = [{transform_indices = @transform_0, window_bounds = array<i64: 7, 8>}, {transform_indices = @transform_1, window_bounds = array<i64: 7, 8>}, {transform_indices = @transform_2, window_bounds = array<i64: 1, 1, 128>}]} {
    %c0 = arith.constant 0 : index
    %c0_0 = arith.constant 0 : index
    %0 = vector.load %arg1[%c0, %c0_0] : memref<7x8xf32, #tpu.memory_space<vmem>>, vector<7x8xf32>
    %c0_1 = arith.constant 0 : index
    %c0_2 = arith.constant 0 : index
    %1 = vector.load %arg2[%c0_1, %c0_2] : memref<7x8xf32, #tpu.memory_space<vmem>>, vector<7x8xf32>
    %2 = arith.subf %1, %0 : vector<7x8xf32>
    %3 = math.absf %2 : vector<7x8xf32>
    %4 = arith.mulf %0, %1 : vector<7x8xf32>
    %5 = vector.extract_strided_slice %3 {offsets = [0, 0], sizes = [3, 8], strides = [1, 1]} : vector<7x8xf32> to vector<3x8xf32>
    %cst = arith.constant dense<0.000000e+00> : vector<8xf32>
    %6 = vector.multi_reduction <add>, %5, %cst [0] : vector<3x8xf32> to vector<8xf32>
    %7 = vector.shape_cast %6 : vector<8xf32> to vector<1x8xf32>
    %8 = vector.extract_strided_slice %4 {offsets = [3, 0], sizes = [4, 8], strides = [1, 1]} : vector<7x8xf32> to vector<4x8xf32>
    %cst_3 = arith.constant dense<0.000000e+00> : vector<8xf32>
    %9 = vector.multi_reduction <add>, %8, %cst_3 [0] : vector<4x8xf32> to vector<8xf32>
    %10 = vector.shape_cast %9 : vector<8xf32> to vector<1x8xf32>
    %cst_4 = arith.constant 0.0416666679 : f32
    %11 = vector.broadcast %cst_4 : f32 to vector<1x8xf32>
    %12 = arith.mulf %11, %7 : vector<1x8xf32>
    %13 = arith.mulf %10, %10 : vector<1x8xf32>
    %cst_5 = arith.constant 1.000000e+00 : f32
    %14 = vector.broadcast %cst_5 : f32 to vector<1x8xf32>
    %15 = arith.subf %14, %13 : vector<1x8xf32>
    %cst_6 = arith.constant 1.250000e-01 : f32
    %16 = vector.broadcast %cst_6 : f32 to vector<1x8xf32>
    %17 = arith.mulf %16, %15 : vector<1x8xf32>
    %18 = arith.addf %12, %17 : vector<1x8xf32>
    %19 = vector.shape_cast %18 : vector<1x8xf32> to vector<1x1x8xf32>
    %cst_7 = arith.constant dense<0.000000e+00> : vector<1xf32>
    %20 = vector.multi_reduction <add>, %19, %cst_7 [1, 2] : vector<1x1x8xf32> to vector<1xf32>
    %21 = vector.shape_cast %20 : vector<1xf32> to vector<1x1x1xf32>
    %22 = vector.extract %21[0, 0, 0] : f32 from vector<1x1x1xf32>
    %23 = vector.broadcast %22 : f32 to vector<1x1x128xf32>
    %c0_8 = arith.constant 0 : index
    %c0_9 = arith.constant 0 : index
    %c0_10 = arith.constant 0 : index
    %24 = vector.load %arg3[%c0_8, %c0_9, %c0_10] : memref<1x1x128xf32, #tpu.memory_space<vmem>>, vector<1x1x128xf32>
    tpu.vector_store %arg3[%c0_8, %c0_9, %c0_10], %23 {strides = array<i32>} : memref<1x1x128xf32, #tpu.memory_space<vmem>>, vector<1x1x128xf32>,
    return
  }
  func.func @transform_0(%arg0: i32) -> (i32, i32) {
    %c0_i32 = arith.constant 0 : i32
    %c0_i32_0 = arith.constant 0 : i32
    return %c0_i32, %arg0 : i32, i32
  }
  func.func @transform_1(%arg0: i32) -> (i32, i32) {
    %c0_i32 = arith.constant 0 : i32
    %c0_i32_0 = arith.constant 0 : i32
    return %c0_i32, %arg0 : i32, i32
  }
  func.func @transform_2(%arg0: i32) -> (i32, i32, i32) {
    %c0_i32 = arith.constant 0 : i32
    %c0_i32_0 = arith.constant 0 : i32
    %c0_i32_1 = arith.constant 0 : i32
    return %arg0, %c0_i32, %c0_i32_0 : i32, i32, i32
  }
}

</mosaic_0001>

<bundles_post_ra>
// kernel: _pose_loss_pallas_from_bd.2
= control target key start
LH: loop header
LB: loop body
LE: loop exit
PB: predicated region body
PF: predicated region fallthrough
CT: control target
= control target key end

     0   :  { %s135_s0 = inlined_call_operand.vmem [shape: f32[8,7], index: 0, kind: input, shape index: {}]   ;;  %s136_s1 = inlined_call_operand.vmem [shape: f32[8,7], index: 1, kind: input, shape index: {}]   ;;  %s137_s2 = inlined_call_operand.hbm [shape: f32[1,1,128], index: 2, kind: output, shape index: {}]  }
   0x1   :  { %v12_v0 = vld [vmem:[%s136_s1] sm:$0x7f] }
   0x2   :  { %v15_v1 = vld [vmem:[%s135_s0] sm:$0x7f]  ;;  %14 = vst [vmem:[#allocation4] sm:$0xff] %v12_v0 }
   0x3   :  { %17 = vst [vmem:[#allocation5] sm:$0xff] %v15_v1 }
   0x4   :  { %7 = vsyncpa [#allocation3], 0  ;;  %vm23_vm0 = vcmask 59392   ;;  %vm34_vm1 = vcmask 60416   ;;  %vm47_vm2 = vcmask 57344   ;;  %s101_s0 = smov [#allocation2]  }
   0x5   :  { %s66_s1 = sshll.u32 %s101_s0, 4  ;;  %s67_s1 = int_to_ptr.vmem [resolvable:$true] %s66_s1 }
   0x6   :  { %s77_s14 = scalar_lea.vmem %s67_s1, 16  ;;  %s81_s15 = scalar_lea.vmem %s67_s1, 32 }
   0x7   :  { %p78_p0 = scmp.ne.s32.totalorder %s67_s1, %s77_s14  ;;  %p82_p1 = scmp.lt.s32.totalorder %s67_s1, %s67_s1 }
   0x8   :  { %p83_p2 = scmp.lt.s32.totalorder %s81_s15, %s77_s14 }
   0x9   :  { %v18_v2 = vld [vmem:[#allocation4] sm:$0x7f] }
   0xa   :  { %v19_v3 = vld [vmem:[#allocation5] sm:$0x7f]  ;;  %p84_p3 = por %p83_p2, %p82_p1 }
   0xb   :  { %v20_v4 = vsub.f32 %v19_v3, %v18_v2  ;;  %v22_v5 = vmul.f32 %v19_v3, %v18_v2 }
   0xc   :  { %p85_p4 = pnand %p84_p3, %p78_p0 }
   0xd   :  { %v21_v6 = vand.u32 2147483647, %v20_v4  ;;  %v32_v7 = vrot.slane %v22_v5, 3 }
   0xf   :  { %v24_v8 = vsel %vm23_vm0, %v21_v6, 0.0  ;;  %v35_v9 = vsel %vm34_vm1, %v32_v7, 0.0 }
  0x10   :  { %v25_v10 = vrot.slane %v24_v8, 4  ;;  %v36_v11 = vrot.slane %v35_v9, 4 }
  0x12   :  { %v26_v12 = vadd.f32 %v25_v10, %v24_v8  ;;  %v37_v13 = vadd.f32 %v36_v11, %v35_v9 }
  0x14   :  { %v27_v14 = vrot.slane %v26_v12, 2  ;;  %v38_v15 = vrot.slane %v37_v13, 2 }
  0x16   :  { %v28_v16 = vadd.f32 %v27_v14, %v26_v12  ;;  %v39_v17 = vadd.f32 %v38_v15, %v37_v13 }
  0x18   :  { %v29_v18 = vrot.slane %v28_v16, 1  ;;  %v40_v19 = vrot.slane %v39_v17, 1 }
  0x1a   :  { %v30_v20 = vadd.f32 %v29_v18, %v28_v16  ;;  %v41_v21 = vadd.f32 %v40_v19, %v39_v17 }
  0x1c   :  { %v43_v22 = vmul.f32 %v41_v21, %v41_v21  ;;  %v42_v23 = vmul.f32 0.041666668, %v30_v20 }
  0x1e   :  { %v44_v24 = vsub.f32 1.0, %v43_v22 }
  0x20   :  { %v45_v25 = vmul.f32 0.125, %v44_v24 }
  0x22   :  { %v46_v26 = vadd.f32 %v45_v25, %v42_v23 }
  0x24   :  { %v48_v27 = vsel %vm47_vm2, %v46_v26, 0.0 }
  0x25   :  { %49 = vadd.xlane.f32.xlu0 %v48_v27 }
  0xb2   :  { %v50_v28 = vpop.xlane.xlu0 %49 }
  0xb3   :  { %v51_v29 = vrot.slane %v50_v28, 4 }
  0xb5   :  { %v52_v30 = vadd.f32 %v51_v29, %v50_v28 }
  0xb7   :  { %v53_v31 = vrot.slane %v52_v30, 2 }
  0xb9   :  { %v54_v32 = vadd.f32 %v53_v31, %v52_v30 }
  0xbb   :  { %v55_v33 = vrot.slane %v54_v32, 1 }
  0xbd   :  { %v56_v34 = vadd.f32 %v55_v33, %v54_v32 }
  0xbf   :  { %74 = vpush %v56_v34 }
  0xf0   :  { %s75_s13 = spop %74 }
  0xf1   :  { %v58_v35 = vstv %s75_s13 }
  0xf2   :  { %59 = vst [vmem:[#allocation2] sm:$0x1] %v58_v35 }
  0xf3   :  { %88 = shalt.err (!%p85_p4)
}
  0xf4   :  { %s89_s18 = scalar_lea.hbm %s137_s2, 16 }
  0xf5   :  { %p90_p5 = scmp.ne.s32.totalorder %s137_s2, %s89_s18  ;;  %p93_p6 = scmp.lt.u32.totalorder %s89_s18, %s137_s2 }
  0xf7   :  { %p95_p7 = pnand %p93_p6, %p90_p5 }
  0xf9   :  { %98 = shalt.err (!%p95_p7)
}
  0xfa   :  { %69 = dma.vmem_to_hbm [thread:$0]  %s67_s1, 16, %s137_s2, [#allocation3]  }
  0xfb   :  { %99 = dma.done.wait [#allocation3], 16  }
  0xfc   :  { %100 = vsyncadd [#allocation3], 4294967280 }
  0xfd   :  { %73 = vsyncpa [#allocation3], 1 }

</bundles_post_ra>
